<compile_context>
chip_gen: v7x
topology: tpu7x:2x2x1
jax: 0.10.0
libtpu: 0.0.40
codegen_flags: <defaults>
</compile_context>

<pallas_src>
import functools

import jax
import jax.numpy as jnp
from jax.experimental import pallas as pl
from jax.experimental.pallas import tpu as pltpu

_TARGET_BLOCK_BYTES = 3 * 1024 * 1024   # ~3 MiB/block -> ~12 MiB pipelined (in+out, 2x buffered)
_VMEM_LIMIT_BYTES = 32 * 1024 * 1024    # safe on v5e/v6e (128 MiB phys) and v7x (64 MiB phys)


def _sublane_multiple(dtype):
    return {4: 8, 2: 16, 1: 32}.get(jnp.dtype(dtype).itemsize, 8)


def _round_up(a, m):
    return ((a + m - 1) // m) * m


def _pick_block_rows(rows, row_bytes, sublane):
    """Largest sublane-aligned row tile within the byte budget; >=2 blocks when possible."""
    budget_rows = max(sublane, (_TARGET_BLOCK_BYTES // max(row_bytes, 1)) // sublane * sublane)
    if rows <= budget_rows:
        if rows >= 2 * sublane:
            # Keep at least 2 grid steps so both v7x TensorCores get work.
            return _round_up(pl.cdiv(rows, 2), sublane)
        return rows  # block == full array extent (always a legal BlockSpec)
    return budget_rows


def _scale_norm_rows_kernel(g_ref, x_ref, o_ref, *, eps):
    # x_ref: (br, D) -- whole rows per block, per-row reduce along lanes.
    x = x_ref[...]
    xf = x.astype(jnp.float32)
    ss = jnp.sum(xf * xf, axis=-1, keepdims=True)                    # (br, 1)
    scale = g_ref[0] * jax.lax.rsqrt(jnp.maximum(ss, eps * eps))     # == g / max(||x||, eps)
    o_ref[...] = (x * scale.astype(x.dtype)).astype(o_ref.dtype)


def _scale_norm_packed_kernel(g_ref, x_ref, p_ref, o_ref, *, eps):
    # x_ref: (br, 128) with k = 128 // D original rows packed per lane row.
    # p_ref: (128, 128) block-diagonal 0/1 selector: (xf*xf) @ P both reduces each
    # D-lane segment and broadcasts the per-row sum back to all its lanes (MXU).
    x = x_ref[...]
    xf = x.astype(jnp.float32)
    ss = jnp.dot(xf * xf, p_ref[...], preferred_element_type=jnp.float32)  # (br, 128)
    scale = g_ref[0] * jax.lax.rsqrt(jnp.maximum(ss, eps * eps))
    o_ref[...] = (x * scale.astype(x.dtype)).astype(o_ref.dtype)


def scale_norm(x, g, eps=1e-5):
    """ScaleNorm forward: x / max(||x||_2[-1], eps) * g.  x: (..., dim); g: (1,)."""
    orig_shape = x.shape
    D = orig_shape[-1]
    x2 = x.reshape(-1, D)                       # free (contiguous) reshape
    R = x2.shape[0]
    itemsize = jnp.dtype(x.dtype).itemsize
    sublane = _sublane_multiple(x.dtype)
    g_smem = g.reshape(1).astype(jnp.float32)

    cparams = pltpu.CompilerParams(
        dimension_semantics=("parallel",),
        vmem_limit_bytes=_VMEM_LIMIT_BYTES,
    )

    packed = (D < 128) and (128 % D == 0) and (R % (128 // D) == 0)

    if packed:
        k = 128 // D
        Rp = R // k
        xp = x2.reshape(Rp, 128)                # free reshape: k consecutive rows per lane row
        lane = jnp.arange(128)
        p_sel = (lane[:, None] // D == lane[None, :] // D).astype(jnp.float32)  # (128, 128)

        br = _pick_block_rows(Rp, 128 * itemsize, sublane)
        grid = (pl.cdiv(Rp, br),)
        cost = pl.CostEstimate(
            flops=int(2 * Rp * 128 * 128 + 3 * x.size),
            transcendentals=int(Rp * 128),
            bytes_accessed=int(2 * x.size * itemsize + 128 * 128 * 4 + 4))

        out = pl.pallas_call(
            functools.partial(_scale_norm_packed_kernel, eps=eps),
            out_shape=jax.ShapeDtypeStruct((Rp, 128), x.dtype),
            grid=grid,
            in_specs=[
                pl.BlockSpec(memory_space=pltpu.MemorySpace.SMEM),   # scalar gain, no double-buffer
                pl.BlockSpec((br, 128), lambda i: (i, 0)),           # lane-dense activations
                pl.BlockSpec((128, 128), lambda i: (0, 0)),          # selector (constant block)
            ],
            out_specs=pl.BlockSpec((br, 128), lambda i: (i, 0)),
            compiler_params=cparams,
            cost_estimate=cost,
        )(g_smem, xp, p_sel)
        return out.reshape(orig_shape)

    # General path: whole rows per block; D is the (full-extent) lane dim.
    br = _pick_block_rows(R, D * itemsize, sublane)
    grid = (pl.cdiv(R, br),)
    cost = pl.CostEstimate(
        flops=int(4 * x.size),
        transcendentals=int(R),
        bytes_accessed=int(2 * x.size * itemsize + 4))

    out = pl.pallas_call(
        functools.partial(_scale_norm_rows_kernel, eps=eps),
        out_shape=jax.ShapeDtypeStruct((R, D), x.dtype),
        grid=grid,
        in_specs=[
            pl.BlockSpec(memory_space=pltpu.MemorySpace.SMEM),
            pl.BlockSpec((br, D), lambda i: (i, 0)),
        ],
        out_specs=pl.BlockSpec((br, D), lambda i: (i, 0)),
        compiler_params=cparams,
        cost_estimate=cost,
    )(g_smem, x2)
    return out.reshape(orig_shape)


def _reference(x, g, eps=1e-5):
    xf = x.astype(jnp.float32)
    n = jnp.maximum(jnp.linalg.norm(xf, axis=-1, keepdims=True), eps)
    return (xf / n * g).astype(x.dtype)


if __name__ == "__main__":
    eps = 1e-5
    key = jax.random.PRNGKey(0)
    k0, k1 = jax.random.split(key)

    # ScaleNorm(dim=32) on a (batch=2, seq=8, hidden=32) activation -> packed lane-dense path.
    B, T, D = 2, 8, 32
    x = jax.random.normal(k0, (B, T, D), dtype=jnp.float32)
    # nn.Parameter(torch.ones(1)) initializes g to 1; use a non-trivial value.
    g = jnp.array([0.75], dtype=jnp.float32)

    y = jax.block_until_ready(scale_norm(x, g, eps=eps))
    y_ref = _reference(x, g, eps=eps)
    assert y.shape == (B, T, D)
    assert jnp.allclose(y, y_ref, atol=1e-5, rtol=1e-5), "packed-path mismatch vs reference"

    # General path (dim already a multiple of 128) -> per-row lane reduce, 2-block grid.
    x2 = jax.random.normal(k1, (2, 8, 128), dtype=jnp.float32)
    y2 = jax.block_until_ready(scale_norm(x2, g, eps=eps))
    y2_ref = _reference(x2, g, eps=eps)
    assert jnp.allclose(y2, y2_ref, atol=1e-5, rtol=1e-5), "general-path mismatch vs reference"

    print("KERNEL_OK")
</pallas_src>

<mosaic_0001>
module attributes {stable_mosaic.version = 11 : i64} {
  func.func @_scale_norm_packed_kernel(%arg0: i32, %arg1: memref<1xf32, #tpu.memory_space<smem>>, %arg2: memref<4x128xf32, #tpu.memory_space<vmem>>, %arg3: memref<128x128xf32, #tpu.memory_space<vmem>>, %arg4: memref<4x128xf32, #tpu.memory_space<vmem>>) attributes {dimension_semantics = [#tpu.dimension_semantics<parallel>], iteration_bounds = array<i64: 1>, scalar_prefetch = 0 : i64, scratch_operands = 0 : i64, tpu.core_type = #tpu.core_type<tc>, window_params = [{transform_indices = @transform_0, window_bounds = array<i64: 1>}, {transform_indices = @transform_1, window_bounds = array<i64: 4, 128>}, {pipeline_mode = #tpu.pipeline_mode<synchronous>, transform_indices = @transform_2, window_bounds = array<i64: 128, 128>}, {transform_indices = @transform_3, window_bounds = array<i64: 4, 128>}]} {
    %c0 = arith.constant 0 : index
    %c0_0 = arith.constant 0 : index
    %0 = vector.load %arg2[%c0, %c0_0] : memref<4x128xf32, #tpu.memory_space<vmem>>, vector<4x128xf32>
    %1 = arith.mulf %0, %0 : vector<4x128xf32>
    %c0_1 = arith.constant 0 : index
    %c0_2 = arith.constant 0 : index
    %2 = vector.load %arg3[%c0_1, %c0_2] : memref<128x128xf32, #tpu.memory_space<vmem>>, vector<128x128xf32>
    %cst = arith.constant dense<0.000000e+00> : vector<4x128xf32>
    %3 = tpu.matmul %1, %2, %cst {dimension_numbers = #tpu.dot_dimension_numbers<[1], [0], [0], [1], [0, 0, 1, 1], [], []>} : vector<4x128xf32>, vector<128x128xf32>, vector<4x128xf32> -> vector<4x128xf32>
    %c0_3 = arith.constant 0 : index
    %4 = memref.load %arg1[%c0_3] : memref<1xf32, #tpu.memory_space<smem>>
    %cst_4 = arith.constant 1.000000e-10 : f32
    %5 = vector.broadcast %cst_4 : f32 to vector<4x128xf32>
    %6 = arith.maximumf %3, %5 : vector<4x128xf32>
    %7 = math.rsqrt %6 : vector<4x128xf32>
    %8 = vector.broadcast %4 : f32 to vector<4x128xf32>
    %9 = arith.mulf %8, %7 : vector<4x128xf32>
    %10 = arith.mulf %0, %9 : vector<4x128xf32>
    %c0_5 = arith.constant 0 : index
    %c0_6 = arith.constant 0 : index
    %11 = vector.load %arg4[%c0_5, %c0_6] : memref<4x128xf32, #tpu.memory_space<vmem>>, vector<4x128xf32>
    tpu.vector_store %arg4[%c0_5, %c0_6], %10 {strides = array<i32>} : memref<4x128xf32, #tpu.memory_space<vmem>>, vector<4x128xf32>,
    return
  }
  func.func @transform_0(%arg0: i32) -> i32 {
    %c0_i32 = arith.constant 0 : i32
    %c0_i32_0 = arith.constant 0 : i32
    return %c0_i32 : i32
  }
  func.func @transform_1(%arg0: i32) -> (i32, i32) {
    %c0_i32 = arith.constant 0 : i32
    %c0_i32_0 = arith.constant 0 : i32
    return %arg0, %c0_i32 : i32, i32
  }
  func.func @transform_2(%arg0: i32) -> (i32, i32) {
    %c0_i32 = arith.constant 0 : i32
    %c0_i32_0 = arith.constant 0 : i32
    %c0_i32_1 = arith.constant 0 : i32
    return %c0_i32, %c0_i32_0 : i32, i32
  }
  func.func @transform_3(%arg0: i32) -> (i32, i32) {
    %c0_i32 = arith.constant 0 : i32
    %c0_i32_0 = arith.constant 0 : i32
    return %arg0, %c0_i32 : i32, i32
  }
}

</mosaic_0001>

<bundles_post_ra>
// kernel: tpu_custom_call.1
= control target key start
LH: loop header
LB: loop body
LE: loop exit
PB: predicated region body
PF: predicated region fallthrough
CT: control target
= control target key end

     0   :  { %9 = vsyncpa [#allocation4], 0  ;;  %s385_s0 = inlined_call_operand.<no memory space> [shape: f32[1], index: 0, kind: input, shape index: {}]   ;;  %s386_s1 = inlined_call_operand.hbm [shape: f32[4,128], index: 1, kind: input, shape index: {}]   ;;  %s387_s2 = inlined_call_operand.hbm [shape: f32[128,128], index: 2, kind: input, shape index: {}]   ;;  %s388_s3 = inlined_call_operand.hbm [shape: f32[4,128], index: 3, kind: output, shape index: {}]  }
   0x1   :  { %10 = vsyncpa [#allocation7], 0 }
   0x2   :  { %11 = vsyncpa [#allocation5], 0  ;;  %s311_s12 = smov [#allocation3]   ;;  %s312_s14 = smov [#allocation6]  }
   0x3   :  { %s20_s13 = sshll.u32 %s311_s12, 4  ;;  %s29_s15 = sshll.u32 %s312_s14, 4  ;;  %s21_s13 = int_to_ptr.vmem [resolvable:$true] %s20_s13  ;;  %s339_s15 = int_to_ptr.vmem [resolvable:$true] %s29_s15 }
   0x4   :  { %s239_s18 = scalar_lea.hbm %s386_s1, 64 }
   0x5   :  { %p240_p0 = scmp.ne.s32.totalorder %s386_s1, %s239_s18  ;;  %p243_p1 = scmp.lt.u32.totalorder %s239_s18, %s386_s1 }
   0x7   :  { %p245_p2 = pnand %p243_p1, %p240_p0 }
   0x9   :  { %248 = shalt.err (!%p245_p2)
}
   0xa   :  { %s249_s23 = scalar_lea.vmem %s21_s13, 64  ;;  %p254_p4 = scmp.lt.s32.totalorder %s21_s13, %s21_s13 }
   0xb   :  { %p250_p3 = scmp.ne.s32.totalorder %s21_s13, %s249_s23  ;;  %p255_p5 = scmp.lt.s32.totalorder %s249_s23, %s249_s23 }
   0xd   :  { %p256_p6 = por %p255_p5, %p254_p4 }
   0xf   :  { %p257_p7 = pnand %p256_p6, %p250_p3 }
  0x11   :  { %260 = shalt.err (!%p257_p7)
}
  0x12   :  { %23 = dma.hbm_to_vmem [thread:$0]  %s386_s1, 64, %s21_s13, [#allocation4]  }
  0x13   :  { %s261_s28 = scalar_lea.hbm %s387_s2, 2048 }
  0x14   :  { %p262_p8 = scmp.ne.s32.totalorder %s387_s2, %s261_s28  ;;  %p265_p9 = scmp.lt.u32.totalorder %s261_s28, %s387_s2 }
  0x16   :  { %p267_p10 = pnand %p265_p9, %p262_p8 }
  0x18   :  { %270 = shalt.err (!%p267_p10)
}
  0x19   :  { %s271_s6 = scalar_lea.vmem %s339_s15, 2048  ;;  %p276_p12 = scmp.lt.s32.totalorder %s339_s15, %s339_s15 }
  0x1a   :  { %p272_p11 = scmp.ne.s32.totalorder %s339_s15, %s271_s6  ;;  %p277_p13 = scmp.lt.s32.totalorder %s271_s6, %s271_s6 }
  0x1c   :  { %p278_p0 = por %p277_p13, %p276_p12 }
  0x1e   :  { %p279_p1 = pnand %p278_p0, %p272_p11 }
  0x20   :  { %282 = shalt.err (!%p279_p1)
}
  0x21   :  { %s313_s1 = smov 128   ;;  %s314_s7 = smov 8  }
  0x22   :  { %35 = dma.hbm_to_vmem [thread:$0]  %s387_s2, 2048, %s339_s15, [#allocation7], %s313_s1, %s313_s1, %s314_s7  }
  0x23   :  { %305 = dma.done.wait [#allocation4], 64  }
  0x24   :  { %306 = vsyncadd [#allocation4], 4294967232 }
  0x25   :  { %307 = dma.done.wait [#allocation7], 2048  }
  0x26   :  { %308 = vsyncadd [#allocation7], 4294965248  ;;  %v315_v0 = vmov 0.0|0.0   ;;  %vm316_vm0 = vmmov 0   ;;  %v317_v1 = vmov 0.0   ;;  %v44_v2 = vld [vmem:[#allocation6] sm:$0xff]  ;;  %v133_v31 = vstv %s385_s0 }
  0x27   :  { %205 = vmatprep.subr.bf16.mxu0 %v315_v0  ;;  %202 = vmatprep.mubr.msk.f32.mxu0 %vm316_vm0, %v317_v1  ;;  %v45_v3 = vld [vmem:[#allocation6 + $0x8] sm:$0xff]  ;;  %v46_v4 = vld [vmem:[#allocation6 + $0x10] sm:$0xff]  ;;  %v47_v6 = vld [vmem:[#allocation6 + $0x18] sm:$0xff]  ;;  %s318_s11 = smov [#allocation8]  }
  0x28   :  { %v206_v5 = vpack.c.bf16 %v45_v3, %v44_v2  ;;  %v209_v7 = vpack.c.bf16 %v47_v6, %v46_v4  ;;  %v48_v8 = vld [vmem:[#allocation6 + $0x20] sm:$0xff]  ;;  %v49_v9 = vld [vmem:[#allocation6 + $0x28] sm:$0xff]  ;;  %v50_v11 = vld [vmem:[#allocation6 + $0x30] sm:$0xff]  ;;  %s143_s12 = sshll.u32 %s318_s11, 4  ;;  %s144_s12 = int_to_ptr.vmem [resolvable:$true] %s143_s12 }
  0x29   :  { %v212_v10 = vpack.c.bf16 %v49_v9, %v48_v8  ;;  %v51_v12 = vld [vmem:[#allocation6 + $0x38] sm:$0xff]  ;;  %v52_v14 = vld [vmem:[#allocation6 + $0x40] sm:$0xff]  ;;  %v53_v15 = vld [vmem:[#allocation6 + $0x48] sm:$0xff]  ;;  %s283_s13 = scalar_lea.vmem %s144_s12, 64  ;;  %p288_p3 = scmp.lt.s32.totalorder %s144_s12, %s144_s12 }
  0x2a   :  { %207 = vmatpush3.bf16.msra.mxu0 %v206_v5  ;;  %v215_v13 = vpack.c.bf16 %v51_v12, %v50_v11  ;;  %v218_v16 = vpack.c.bf16 %v53_v15, %v52_v14  ;;  %v54_v17 = vld [vmem:[#allocation6 + $0x50] sm:$0xff]  ;;  %v55_v18 = vld [vmem:[#allocation6 + $0x58] sm:$0xff]  ;;  %v56_v20 = vld [vmem:[#allocation6 + $0x60] sm:$0xff]  ;;  %p284_p2 = scmp.ne.s32.totalorder %s144_s12, %s283_s13  ;;  %p289_p4 = scmp.lt.s32.totalorder %s283_s13, %s283_s13 }
  0x2b   :  { %208 = vmatprep.subr.bf16.mxu0 %v315_v0  ;;  %v221_v19 = vpack.c.bf16 %v55_v18, %v54_v17  ;;  %v57_v21 = vld [vmem:[#allocation6 + $0x68] sm:$0xff]  ;;  %v58_v23 = vld [vmem:[#allocation6 + $0x70] sm:$0xff]  ;;  %v59_v24 = vld [vmem:[#allocation6 + $0x78] sm:$0xff] }
  0x2c   :  { %v224_v22 = vpack.c.bf16 %v57_v21, %v56_v20  ;;  %v227_v25 = vpack.c.bf16 %v59_v24, %v58_v23  ;;  %v42_v26 = vld [vmem:[#allocation3] sm:$0xf]  ;;  %p290_p5 = por %p289_p4, %p288_p3 }
  0x2d   :  { %v43_v27 = vmul.f32 %v42_v26, %v42_v26 }
  0x2e   :  { %210 = vmatpush3.bf16.msra.mxu0 %v209_v7  ;;  %p291_p6 = pnand %p290_p5, %p284_p2 }
  0x2f   :  { %211 = vmatprep.subr.bf16.mxu0 %v315_v0 }
  0x32   :  { %213 = vmatpush3.bf16.msra.mxu0 %v212_v10 }
  0x33   :  { %214 = vmatprep.subr.bf16.mxu0 %v315_v0 }
  0x36   :  { %216 = vmatpush3.bf16.msra.mxu0 %v215_v13 }
  0x37   :  { %217 = vmatprep.subr.bf16.mxu0 %v315_v0 }
  0x3a   :  { %219 = vmatpush3.bf16.msra.mxu0 %v218_v16 }
  0x3b   :  { %220 = vmatprep.subr.bf16.mxu0 %v315_v0 }
  0x3e   :  { %222 = vmatpush3.bf16.msra.mxu0 %v221_v19 }
  0x3f   :  { %223 = vmatprep.subr.bf16.mxu0 %v315_v0 }
  0x42   :  { %225 = vmatpush3.bf16.msra.mxu0 %v224_v22 }
  0x43   :  { %226 = vmatprep.subr.bf16.mxu0 %v315_v0 }
  0x46   :  { %228 = vmatpush3.bf16.msra.mxu0 %v227_v25 }
  0x49   :  { %203 = vmatmul.mubr.f32.vlgmr.msra.gmra.mrb[0].mxu0 %v43_v27 }
 0x11c   :  { %v126_v28 = vpop.f32.mrb[0].mxu0 }
 0x11d   :  { %v131_v29 = vmax.f32 %v126_v28, 1e-10  ;;  %v204_v30 = vpop.f32.mrb[1].mxu0 }
 0x11f   :  { %237 = vrsqrt.f32 %v131_v29 }
 0x129   :  { %v238_v32 = vpop.eup %237 }
 0x12a   :  { %v134_v33 = vmul.f32 %v238_v32, %v133_v31 }
 0x12c   :  { %v135_v34 = vmul.f32 %v134_v33, %v42_v26 }
 0x12e   :  { %136 = vst [vmem:[#allocation8] sm:$0xf] %v135_v34 }
 0x12f   :  { %294 = shalt.err (!%p291_p6)
}
 0x130   :  { %s295_s16 = scalar_lea.hbm %s388_s3, 64 }
 0x131   :  { %p296_p7 = scmp.ne.s32.totalorder %s388_s3, %s295_s16  ;;  %p299_p8 = scmp.lt.u32.totalorder %s295_s16, %s388_s3 }
 0x133   :  { %p301_p9 = pnand %p299_p8, %p296_p7 }
 0x135   :  { %304 = shalt.err (!%p301_p9)
}
 0x136   :  { %146 = dma.vmem_to_hbm [thread:$0]  %s144_s12, 64, %s388_s3, [#allocation5]  }
 0x137   :  { %309 = dma.done.wait [#allocation5], 64  }
 0x138   :  { %310 = vsyncadd [#allocation5], 4294967232 }
 0x139   :  { %150 = vsyncpa [#allocation4], 1 }
 0x13a   :  { %151 = vsyncpa [#allocation7], 1 }
 0x13b   :  { %152 = vsyncpa [#allocation5], 1 }

</bundles_post_ra>
